<compile_context>
chip_gen: v7x
topology: tpu7x:2x2x1
jax: 0.10.0
libtpu: 0.0.40
codegen_flags: <defaults>
</compile_context>

<pallas_src>
import jax
import jax.numpy as jnp
import numpy as np
from jax.experimental import pallas as pl
from jax.experimental.pallas import tpu as pltpu

INPUT_DIM = 2
HIDDEN_DIM = 64
OUTPUT_DIM = 1
N_HIDDEN_LAYERS = 4   # fc2..fc5 (64 -> 64); fc1 and fc6 are handled separately
LANE = 128


def _ceil_to(x, m):
    return ((x + m - 1) // m) * m


def _full_spec(shape):
    zeros = (0,) * len(shape)
    return pl.BlockSpec(tuple(shape), lambda i, _z=zeros: _z)


def _mlp_kernel(xt_ref, w1_ref, b1_ref, wh_ref, bh_ref, w6_ref, b6_ref, o_ref):
    """One batch tile. Transposed layout: activations are (features, tile_n)."""
    x = xt_ref[...]                                   # (2, T)   f32
    w1 = w1_ref[...]                                  # (64, 2)  f32

    # fc1 (K=2): two VPU broadcast-FMAs instead of a degenerate MXU matmul.
    h = w1[:, 0:1] * x[0:1, :] + w1[:, 1:2] * x[1:2, :] + b1_ref[...]
    h = jnp.maximum(h, 0.0)                           # (64, T)  f32

    # fc2..fc5: bf16 MXU matmuls, f32 accumulation, f32 bias + ReLU.
    for l in range(N_HIDDEN_LAYERS):
        h = jnp.dot(wh_ref[l], h.astype(jnp.bfloat16),
                    preferred_element_type=jnp.float32)
        h = jnp.maximum(h + bh_ref[l], 0.0)           # (64, T)  f32

    # fc6: (1, 64) @ (64, T); scalar bias lives in SMEM.
    out = jnp.dot(w6_ref[...], h.astype(jnp.bfloat16),
                  preferred_element_type=jnp.float32)
    o_ref[...] = (out + b6_ref[0, 0]).astype(o_ref.dtype)


def basis_function_learner(x, params, *, tile_n=4096):
    """Forward pass. x: (N, INPUT_DIM) -> (N, OUTPUT_DIM), f32."""
    N, D = x.shape
    assert D == INPUT_DIM

    # ---- tile selection (batch lives on the lane axis) ----
    n_min = max(_ceil_to(N, LANE), LANE)
    tile = min(_ceil_to(tile_n, LANE), n_min)
    if n_min // tile < 2 and n_min >= 2 * LANE:
        # keep at least 2 grid steps so both v7x TensorCores are used
        tile = _ceil_to(n_min // 2, LANE)
    n_pad = _ceil_to(N, tile)
    grid = n_pad // tile

    # ---- wrapper-side layout plumbing: transpose + pad so batch is lane-dense ----
    xt = jnp.pad(x.astype(jnp.float32).T, ((0, 0), (0, n_pad - N)))

    w1 = params["w1"].astype(jnp.float32)       # (64, 2)
    b1 = params["b1"].astype(jnp.float32)       # (64, 1)
    wh = params["wh"].astype(jnp.bfloat16)      # (4, 64, 64)   bf16 MXU inputs
    bh = params["bh"].astype(jnp.float32)       # (4, 64, 1)
    w6 = params["w6"].astype(jnp.bfloat16)      # (1, 64)
    b6 = params["b6"].astype(jnp.float32)       # (1, 1) -> SMEM scalar

    in_specs = [
        pl.BlockSpec((INPUT_DIM, tile), lambda i: (0, i)),
        _full_spec(w1.shape),
        _full_spec(b1.shape),
        _full_spec(wh.shape),
        _full_spec(bh.shape),
        _full_spec(w6.shape),
        pl.BlockSpec(memory_space=pltpu.MemorySpace.SMEM),
    ]
    out_spec = pl.BlockSpec((OUTPUT_DIM, tile), lambda i: (0, i))

    yt = pl.pallas_call(
        _mlp_kernel,
        out_shape=jax.ShapeDtypeStruct((OUTPUT_DIM, n_pad), jnp.float32),
        grid_spec=pltpu.PrefetchScalarGridSpec(
            num_scalar_prefetch=0,
            grid=(grid,),
            in_specs=in_specs,
            out_specs=out_spec,
        ),
        compiler_params=pltpu.CompilerParams(
            dimension_semantics=("parallel",),
        ),
    )(xt, w1, b1, wh, bh, w6, b6)

    return yt.T[:N]   # (N, 1)


def init_params(key):
    """PyTorch-style nn.Linear init; weights stored in (out_features, in_features)."""
    def linear(k, din, dout):
        kw, kb = jax.random.split(k)
        bound = 1.0 / (din ** 0.5)
        w = jax.random.uniform(kw, (dout, din), jnp.float32, -bound, bound)
        b = jax.random.uniform(kb, (dout, 1), jnp.float32, -bound, bound)
        return w, b

    keys = jax.random.split(key, 6)
    w1, b1 = linear(keys[0], INPUT_DIM, HIDDEN_DIM)
    ws, bs = [], []
    for l in range(N_HIDDEN_LAYERS):
        w, b = linear(keys[1 + l], HIDDEN_DIM, HIDDEN_DIM)
        ws.append(w)
        bs.append(b)
    w6, b6 = linear(keys[5], HIDDEN_DIM, OUTPUT_DIM)
    return {"w1": w1, "b1": b1,
            "wh": jnp.stack(ws), "bh": jnp.stack(bs),
            "w6": w6, "b6": b6}


def reference_forward_f32(x, params):
    """Pure-f32 JAX reference (matches the PyTorch module semantics)."""
    hi = jax.lax.Precision.HIGHEST
    h = jnp.maximum(jnp.dot(x, params["w1"].T, precision=hi) + params["b1"].T, 0.0)
    for l in range(N_HIDDEN_LAYERS):
        h = jnp.maximum(
            jnp.dot(h, params["wh"][l].T, precision=hi) + params["bh"][l].T, 0.0)
    return jnp.dot(h, params["w6"].T, precision=hi) + params["b6"].T


def reference_forward_bf16(x, params):
    """JAX reference with the same bf16-input / f32-accumulate matmul precision."""
    hi = jax.lax.Precision.HIGHEST
    h = jnp.maximum(jnp.dot(x, params["w1"].T, precision=hi) + params["b1"].T, 0.0)
    for l in range(N_HIDDEN_LAYERS):
        w = params["wh"][l].astype(jnp.bfloat16)
        h = jnp.dot(h.astype(jnp.bfloat16), w.T,
                    preferred_element_type=jnp.float32) + params["bh"][l].T
        h = jnp.maximum(h, 0.0)
    w6 = params["w6"].astype(jnp.bfloat16)
    return jnp.dot(h.astype(jnp.bfloat16), w6.T,
                   preferred_element_type=jnp.float32) + params["b6"].T


if __name__ == "__main__":
    key = jax.random.PRNGKey(0)
    key, kx = jax.random.split(key)

    # Small deterministic test: 500 2-D points (exercises padding + 2-step grid).
    N = 500
    x = jax.random.normal(kx, (N, INPUT_DIM), jnp.float32)
    params = init_params(key)

    out = basis_function_learner(x, params)
    out = jax.block_until_ready(out)
    assert out.shape == (N, OUTPUT_DIM)

    out_np = np.asarray(out)
    ref_bf16 = np.asarray(reference_forward_bf16(x, params))
    ref_f32 = np.asarray(reference_forward_f32(x, params))

    # Tight check vs a reference using the same matmul precision as the kernel.
    assert np.allclose(out_np, ref_bf16, atol=5e-3, rtol=5e-3), (
        "mismatch vs bf16-matmul reference: max abs err "
        f"{np.max(np.abs(out_np - ref_bf16))}")
    # Loose check vs the full-f32 reference (bf16 MXU inputs are a precision
    # tradeoff, not a semantics change).
    assert np.allclose(out_np, ref_f32, atol=5e-2, rtol=5e-2), (
        "mismatch vs f32 reference: max abs err "
        f"{np.max(np.abs(out_np - ref_f32))}")

    print("KERNEL_OK")
</pallas_src>

<mosaic_0001>
module attributes {stable_mosaic.version = 11 : i64} {
  func.func @_mlp_kernel(%arg0: i32, %arg1: memref<2x256xf32, #tpu.memory_space<vmem>>, %arg2: memref<64x2xf32, #tpu.memory_space<vmem>>, %arg3: memref<64x1xf32, #tpu.memory_space<vmem>>, %arg4: memref<4x64x64xbf16, #tpu.memory_space<vmem>>, %arg5: memref<4x64x1xf32, #tpu.memory_space<vmem>>, %arg6: memref<1x64xbf16, #tpu.memory_space<vmem>>, %arg7: memref<1x1xf32, #tpu.memory_space<smem>>, %arg8: memref<1x256xf32, #tpu.memory_space<vmem>>) attributes {dimension_semantics = [#tpu.dimension_semantics<parallel>], iteration_bounds = array<i64: 2>, scalar_prefetch = 0 : i64, scratch_operands = 0 : i64, tpu.core_type = #tpu.core_type<tc>, window_params = [{transform_indices = @transform_0, window_bounds = array<i64: 2, 256>}, {pipeline_mode = #tpu.pipeline_mode<synchronous>, transform_indices = @transform_1, window_bounds = array<i64: 64, 2>}, {pipeline_mode = #tpu.pipeline_mode<synchronous>, transform_indices = @transform_2, window_bounds = array<i64: 64, 1>}, {pipeline_mode = #tpu.pipeline_mode<synchronous>, transform_indices = @transform_3, window_bounds = array<i64: 4, 64, 64>}, {pipeline_mode = #tpu.pipeline_mode<synchronous>, transform_indices = @transform_4, window_bounds = array<i64: 4, 64, 1>}, {pipeline_mode = #tpu.pipeline_mode<synchronous>, transform_indices = @transform_5, window_bounds = array<i64: 1, 64>}, {transform_indices = @transform_6, window_bounds = array<i64: 1, 1>}, {transform_indices = @transform_7, window_bounds = array<i64: 1, 256>}]} {
    %c0 = arith.constant 0 : index
    %c0_0 = arith.constant 0 : index
    %0 = vector.load %arg1[%c0, %c0_0] : memref<2x256xf32, #tpu.memory_space<vmem>>, vector<2x256xf32>
    %c0_1 = arith.constant 0 : index
    %c0_2 = arith.constant 0 : index
    %1 = vector.load %arg2[%c0_1, %c0_2] : memref<64x2xf32, #tpu.memory_space<vmem>>, vector<64x2xf32>
    %2 = vector.extract_strided_slice %1 {offsets = [0, 0], sizes = [64, 1], strides = [1, 1]} : vector<64x2xf32> to vector<64x1xf32>
    %3 = vector.extract_strided_slice %0 {offsets = [0, 0], sizes = [1, 256], strides = [1, 1]} : vector<2x256xf32> to vector<1x256xf32>
    %4 = vector.broadcast %2 : vector<64x1xf32> to vector<64x256xf32>
    %5 = vector.broadcast %3 : vector<1x256xf32> to vector<64x256xf32>
    %6 = arith.mulf %4, %5 : vector<64x256xf32>
    %7 = vector.extract_strided_slice %1 {offsets = [0, 1], sizes = [64, 1], strides = [1, 1]} : vector<64x2xf32> to vector<64x1xf32>
    %8 = vector.extract_strided_slice %0 {offsets = [1, 0], sizes = [1, 256], strides = [1, 1]} : vector<2x256xf32> to vector<1x256xf32>
    %9 = vector.broadcast %7 : vector<64x1xf32> to vector<64x256xf32>
    %10 = vector.broadcast %8 : vector<1x256xf32> to vector<64x256xf32>
    %11 = arith.mulf %9, %10 : vector<64x256xf32>
    %12 = arith.addf %6, %11 : vector<64x256xf32>
    %c0_3 = arith.constant 0 : index
    %c0_4 = arith.constant 0 : index
    %13 = vector.load %arg3[%c0_3, %c0_4] : memref<64x1xf32, #tpu.memory_space<vmem>>, vector<64x1xf32>
    %14 = vector.broadcast %13 : vector<64x1xf32> to vector<64x256xf32>
    %15 = arith.addf %12, %14 : vector<64x256xf32>
    %cst = arith.constant 0.000000e+00 : f32
    %16 = vector.broadcast %cst : f32 to vector<64x256xf32>
    %17 = arith.maximumf %15, %16 : vector<64x256xf32>
    %c0_5 = arith.constant 0 : index
    %c0_6 = arith.constant 0 : index
    %c0_7 = arith.constant 0 : index
    %18 = vector.load %arg4[%c0_5, %c0_6, %c0_7] : memref<4x64x64xbf16, #tpu.memory_space<vmem>>, vector<1x64x64xbf16>
    %19 = vector.shape_cast %18 : vector<1x64x64xbf16> to vector<64x64xbf16>
    %20 = arith.truncf %17 : vector<64x256xf32> to vector<64x256xbf16>
    %cst_8 = arith.constant dense<0.000000e+00> : vector<64x256xf32>
    %21 = tpu.matmul %19, %20, %cst_8 {dimension_numbers = #tpu.dot_dimension_numbers<[1], [0], [0], [1], [0, 0, 1, 1], [], []>} : vector<64x64xbf16>, vector<64x256xbf16>, vector<64x256xf32> -> vector<64x256xf32>
    %c0_9 = arith.constant 0 : index
    %c0_10 = arith.constant 0 : index
    %c0_11 = arith.constant 0 : index
    %22 = vector.load %arg5[%c0_9, %c0_10, %c0_11] : memref<4x64x1xf32, #tpu.memory_space<vmem>>, vector<1x64x1xf32>
    %23 = vector.shape_cast %22 : vector<1x64x1xf32> to vector<64x1xf32>
    %24 = vector.broadcast %23 : vector<64x1xf32> to vector<64x256xf32>
    %25 = arith.addf %21, %24 : vector<64x256xf32>
    %cst_12 = arith.constant 0.000000e+00 : f32
    %26 = vector.broadcast %cst_12 : f32 to vector<64x256xf32>
    %27 = arith.maximumf %25, %26 : vector<64x256xf32>
    %c1 = arith.constant 1 : index
    %c0_13 = arith.constant 0 : index
    %c0_14 = arith.constant 0 : index
    %28 = vector.load %arg4[%c1, %c0_13, %c0_14] : memref<4x64x64xbf16, #tpu.memory_space<vmem>>, vector<1x64x64xbf16>
    %29 = vector.shape_cast %28 : vector<1x64x64xbf16> to vector<64x64xbf16>
    %30 = arith.truncf %27 : vector<64x256xf32> to vector<64x256xbf16>
    %cst_15 = arith.constant dense<0.000000e+00> : vector<64x256xf32>
    %31 = tpu.matmul %29, %30, %cst_15 {dimension_numbers = #tpu.dot_dimension_numbers<[1], [0], [0], [1], [0, 0, 1, 1], [], []>} : vector<64x64xbf16>, vector<64x256xbf16>, vector<64x256xf32> -> vector<64x256xf32>
    %c1_16 = arith.constant 1 : index
    %c0_17 = arith.constant 0 : index
    %c0_18 = arith.constant 0 : index
    %32 = vector.load %arg5[%c1_16, %c0_17, %c0_18] : memref<4x64x1xf32, #tpu.memory_space<vmem>>, vector<1x64x1xf32>
    %33 = vector.shape_cast %32 : vector<1x64x1xf32> to vector<64x1xf32>
    %34 = vector.broadcast %33 : vector<64x1xf32> to vector<64x256xf32>
    %35 = arith.addf %31, %34 : vector<64x256xf32>
    %cst_19 = arith.constant 0.000000e+00 : f32
    %36 = vector.broadcast %cst_19 : f32 to vector<64x256xf32>
    %37 = arith.maximumf %35, %36 : vector<64x256xf32>
    %c2 = arith.constant 2 : index
    %c0_20 = arith.constant 0 : index
    %c0_21 = arith.constant 0 : index
    %38 = vector.load %arg4[%c2, %c0_20, %c0_21] : memref<4x64x64xbf16, #tpu.memory_space<vmem>>, vector<1x64x64xbf16>
    %39 = vector.shape_cast %38 : vector<1x64x64xbf16> to vector<64x64xbf16>
    %40 = arith.truncf %37 : vector<64x256xf32> to vector<64x256xbf16>
    %cst_22 = arith.constant dense<0.000000e+00> : vector<64x256xf32>
    %41 = tpu.matmul %39, %40, %cst_22 {dimension_numbers = #tpu.dot_dimension_numbers<[1], [0], [0], [1], [0, 0, 1, 1], [], []>} : vector<64x64xbf16>, vector<64x256xbf16>, vector<64x256xf32> -> vector<64x256xf32>
    %c2_23 = arith.constant 2 : index
    %c0_24 = arith.constant 0 : index
    %c0_25 = arith.constant 0 : index
    %42 = vector.load %arg5[%c2_23, %c0_24, %c0_25] : memref<4x64x1xf32, #tpu.memory_space<vmem>>, vector<1x64x1xf32>
    %43 = vector.shape_cast %42 : vector<1x64x1xf32> to vector<64x1xf32>
    %44 = vector.broadcast %43 : vector<64x1xf32> to vector<64x256xf32>
    %45 = arith.addf %41, %44 : vector<64x256xf32>
    %cst_26 = arith.constant 0.000000e+00 : f32
    %46 = vector.broadcast %cst_26 : f32 to vector<64x256xf32>
    %47 = arith.maximumf %45, %46 : vector<64x256xf32>
    %c3 = arith.constant 3 : index
    %c0_27 = arith.constant 0 : index
    %c0_28 = arith.constant 0 : index
    %48 = vector.load %arg4[%c3, %c0_27, %c0_28] : memref<4x64x64xbf16, #tpu.memory_space<vmem>>, vector<1x64x64xbf16>
    %49 = vector.shape_cast %48 : vector<1x64x64xbf16> to vector<64x64xbf16>
    %50 = arith.truncf %47 : vector<64x256xf32> to vector<64x256xbf16>
    %cst_29 = arith.constant dense<0.000000e+00> : vector<64x256xf32>
    %51 = tpu.matmul %49, %50, %cst_29 {dimension_numbers = #tpu.dot_dimension_numbers<[1], [0], [0], [1], [0, 0, 1, 1], [], []>} : vector<64x64xbf16>, vector<64x256xbf16>, vector<64x256xf32> -> vector<64x256xf32>
    %c3_30 = arith.constant 3 : index
    %c0_31 = arith.constant 0 : index
    %c0_32 = arith.constant 0 : index
    %52 = vector.load %arg5[%c3_30, %c0_31, %c0_32] : memref<4x64x1xf32, #tpu.memory_space<vmem>>, vector<1x64x1xf32>
    %53 = vector.shape_cast %52 : vector<1x64x1xf32> to vector<64x1xf32>
    %54 = vector.broadcast %53 : vector<64x1xf32> to vector<64x256xf32>
    %55 = arith.addf %51, %54 : vector<64x256xf32>
    %cst_33 = arith.constant 0.000000e+00 : f32
    %56 = vector.broadcast %cst_33 : f32 to vector<64x256xf32>
    %57 = arith.maximumf %55, %56 : vector<64x256xf32>
    %c0_34 = arith.constant 0 : index
    %c0_35 = arith.constant 0 : index
    %58 = vector.load %arg6[%c0_34, %c0_35] : memref<1x64xbf16, #tpu.memory_space<vmem>>, vector<1x64xbf16>
    %59 = arith.truncf %57 : vector<64x256xf32> to vector<64x256xbf16>
    %cst_36 = arith.constant dense<0.000000e+00> : vector<1x256xf32>
    %60 = tpu.matmul %58, %59, %cst_36 {dimension_numbers = #tpu.dot_dimension_numbers<[1], [0], [0], [1], [0, 0, 1, 1], [], []>} : vector<1x64xbf16>, vector<64x256xbf16>, vector<1x256xf32> -> vector<1x256xf32>
    %c0_37 = arith.constant 0 : index
    %c0_38 = arith.constant 0 : index
    %61 = memref.load %arg7[%c0_37, %c0_38] : memref<1x1xf32, #tpu.memory_space<smem>>
    %62 = vector.broadcast %61 : f32 to vector<1x256xf32>
    %63 = arith.addf %60, %62 : vector<1x256xf32>
    %c0_39 = arith.constant 0 : index
    %c0_40 = arith.constant 0 : index
    %64 = vector.load %arg8[%c0_39, %c0_40] : memref<1x256xf32, #tpu.memory_space<vmem>>, vector<1x256xf32>
    tpu.vector_store %arg8[%c0_39, %c0_40], %63 {strides = array<i32>} : memref<1x256xf32, #tpu.memory_space<vmem>>, vector<1x256xf32>,
    return
  }
  func.func @transform_0(%arg0: i32) -> (i32, i32) {
    %c0_i32 = arith.constant 0 : i32
    %c0_i32_0 = arith.constant 0 : i32
    return %c0_i32, %arg0 : i32, i32
  }
  func.func @transform_1(%arg0: i32) -> (i32, i32) {
    %c0_i32 = arith.constant 0 : i32
    %c0_i32_0 = arith.constant 0 : i32
    %c0_i32_1 = arith.constant 0 : i32
    return %c0_i32, %c0_i32_0 : i32, i32
  }
  func.func @transform_2(%arg0: i32) -> (i32, i32) {
    %c0_i32 = arith.constant 0 : i32
    %c0_i32_0 = arith.constant 0 : i32
    %c0_i32_1 = arith.constant 0 : i32
    return %c0_i32, %c0_i32_0 : i32, i32
  }
  func.func @transform_3(%arg0: i32) -> (i32, i32, i32) {
    %c0_i32 = arith.constant 0 : i32
    %c0_i32_0 = arith.constant 0 : i32
    %c0_i32_1 = arith.constant 0 : i32
    %c0_i32_2 = arith.constant 0 : i32
    return %c0_i32, %c0_i32_0, %c0_i32_1 : i32, i32, i32
  }
  func.func @transform_4(%arg0: i32) -> (i32, i32, i32) {
    %c0_i32 = arith.constant 0 : i32
    %c0_i32_0 = arith.constant 0 : i32
    %c0_i32_1 = arith.constant 0 : i32
    %c0_i32_2 = arith.constant 0 : i32
    return %c0_i32, %c0_i32_0, %c0_i32_1 : i32, i32, i32
  }
  func.func @transform_5(%arg0: i32) -> (i32, i32) {
    %c0_i32 = arith.constant 0 : i32
    %c0_i32_0 = arith.constant 0 : i32
    %c0_i32_1 = arith.constant 0 : i32
    return %c0_i32, %c0_i32_0 : i32, i32
  }
  func.func @transform_6(%arg0: i32) -> (i32, i32) {
    %c0_i32 = arith.constant 0 : i32
    %c0_i32_0 = arith.constant 0 : i32
    %c0_i32_1 = arith.constant 0 : i32
    return %c0_i32, %c0_i32_0 : i32, i32
  }
  func.func @transform_7(%arg0: i32) -> (i32, i32) {
    %c0_i32 = arith.constant 0 : i32
    %c0_i32_0 = arith.constant 0 : i32
    return %c0_i32, %arg0 : i32, i32
  }
}

</mosaic_0001>

<bundles_post_ra>
// kernel: tpu_custom_call.1
= control target key start
LH: loop header
LB: loop body
LE: loop exit
PB: predicated region body
PF: predicated region fallthrough
CT: control target
= control target key end

     0   :  { %s2090_s0 = inlined_call_operand.vmem [shape: f32[2,512], index: 0, kind: input, shape index: {}]   ;;  %s2091_s1 = inlined_call_operand.vmem [shape: f32[64,2], index: 1, kind: input, shape index: {}]   ;;  %s2092_s2 = inlined_call_operand.vmem [shape: f32[64,1], index: 2, kind: input, shape index: {}]   ;;  %s2093_s3 = inlined_call_operand.vmem [shape: bf16[4,64,64], index: 3, kind: input, shape index: {}]   ;;  %s2094_s4 = inlined_call_operand.vmem [shape: f32[4,64,1], index: 4, kind: input, shape index: {}]   ;;  %s2095_s5 = inlined_call_operand.vmem [shape: bf16[1,64], index: 5, kind: input, shape index: {}]   ;;  %s2096_s6 = inlined_call_operand.<no memory space> [shape: f32[1,1], index: 6, kind: input, shape index: {}]   ;;  %s2097_s7 = inlined_call_operand.hbm [shape: f32[1,512], index: 7, kind: output, shape index: {}]  }
   0x1   :  { %12 = sst [smem:[#allocation2]] %s2096_s6 }
   0x2   :  { %13 = vsyncpa [#allocation4], 0 }
   0x3   :  { %15 = vsyncpa [#allocation4 + $0x1], 0  ;;  %s1700_s26 = smov 0   ;;  %s1702_s27 = smov 0  }
   0x4   :  { %s1704_s28 = smov 0   ;;  %s1706_s29 = smov 0  }
   0x5 LB: > { %s1721_s6 = sadd.s32 4294967295, %s1651_s29   ;;  %s1427_s30 = sadd.s32 4294967294, %s1651_s29   ;;  %s1651_s29 = sphi %s1706_s29, %s2103_s29   ;;  %s1647_s28 = sphi %s1704_s28, %s2102_s28   ;;  %s1643_s27 = sphi %s1702_s27, %s2101_s27   ;;  %s1639_s26 = sphi %s1700_s26, %s2100_s26  }
   0x6   : > { %s1725_s8 = sadd.s32 1, %s1651_s29   ;;  %s180_s9 = sadd.s32 1, %s1647_s28 }
   0x7   : > { %s177_s10 = ssub.s32 %s1651_s29, %s1725_s8  ;;  %p190_p0 = scmp.ne.s32.totalorder %s1647_s28, %s1643_s27 }
   0x8   : > { %p178_p1 = scmp.eq.s32.totalorder %s177_s10, 0  ;;  %p191_p2 = scmp.eq.s32.totalorder %s1721_s6, 1 }
   0x9   : > { %p196_p3 = scmp.ne.s32.totalorder %s1643_s27, %s1639_s26  ;;  %p197_p4 = scmp.eq.s32.totalorder %s1427_s30, 1 }
   0xa   : > { %s1736_s11 = scalar_select %p178_p1, %s1647_s28, %s180_s9  }
   0xb   : > { %p1738_p5 = por %p191_p2, %p190_p0  ;;  %p1742_p6 = por %p197_p4, %p196_p3 }
   0xc   : > { %p1430_p7 = scmp.ge.s32.totalorder %s1651_s29, 1  ;;  %p242_p8 = scmp.lt.s32.totalorder %s1651_s29, 3 }
   0xe   : > { %p243_p9 = pnand %p1430_p7, %p242_p8 }
   0xf   : > { %v285_v0 = vld [vmem:[%s2091_s1 + $0x10] sm:$0xff] (!%p243_p9)  ;;  %v283_v1 = vld [vmem:[%s2091_s1] sm:$0xff] (!%p243_p9)  ;;  %v1653_v2 = vmov (!%p243_p9), 1   ;;  %v284_v4 = vld [vmem:[%s2091_s1 + $0x8] sm:$0xff] (!%p243_p9)  ;;  %v1654_v5 = vmov (!%p243_p9), 0   ;;  %s1432_s16 = sshll.u32 (!%p243_p9), %s1721_s6, 1  ;;  %v332_v50 = vlaneseq (!%p243_p9) }
  0x10   : > { %246 = sbr.rel (%p243_p9) target bundleno = 1449 (0x5a9), region = 48  ;;  %1565 = vset.pattern.permute.xlu0 (!%p243_p9), %v1653_v2  ;;  %1563 = vset.pattern.permute.xlu1 (!%p243_p9), %v1653_v2  ;;  %v287_v3 = vld [vmem:[%s2091_s1 + $0x20] sm:$0xff] (!%p243_p9)  ;;  %v289_v6 = vld [vmem:[%s2091_s1 + $0x30] sm:$0xff] (!%p243_p9)  ;;  %v286_v7 = vld [vmem:[%s2091_s1 + $0x18] sm:$0xff] (!%p243_p9)  ;;  %p275_p10 = scmp.lt.s32.totalorder (!%p243_p9), %s1432_s16, 3  ;;  %vm612_vm0 = vcmask (!%p243_p9), 523264  }
  0x11   : > { %375 = vperm.xlu0 (!%p243_p9), %1565, %v285_v0   ;;  %367 = vperm.xlu1 (!%p243_p9), %1563, %v283_v1   ;;  %v448_v8 = vld [vmem:[%s2092_s2] sm:$0xff] (!%p243_p9)  ;;  %v449_v9 = vld [vmem:[%s2092_s2 + $0x8] sm:$0xff] (!%p243_p9)  ;;  %v451_v11 = vld [vmem:[%s2092_s2 + $0x18] sm:$0xff] (!%p243_p9)  ;;  %v1901_v53 = vshrl.u32 (!%p243_p9), %v332_v50, 7  ;;  %s1284_s14 = sld [smem:[#allocation2]] (!%p243_p9)  ;;  %s271_s15 = sand.u32 (!%p243_p9), 1, %s1643_s27  }
  0x12   : > { %657 = vmatprep.mubr.bf16.mxu0 (!%p243_p9), %v1654_v5  ;;  %844 = vmatprep.mubr.bf16.mxu1 (!%p243_p9), %v1654_v5  ;;  %v288_v10 = vld [vmem:[%s2091_s1 + $0x28] sm:$0xff] (!%p243_p9)  ;;  %v544_v13 = vld [vmem:[%s2094_s4] sm:$0xff] (!%p243_p9)  ;;  %v450_v14 = vld [vmem:[%s2092_s2 + $0x10] sm:$0xff] (!%p243_p9)  ;;  %s1520_s17 = sshll.u32 (!%p243_p9), %s1721_s6, 5  ;;  %vm1350_vm1 = vcmp.lt.s32.totalorder (!%p243_p9), %v332_v50, 256  ;;  %s1354_s23 = scalar_lea.sflag (!%p243_p9), [#allocation4], %s271_s15 }
  0x13   : > { %v453_v12 = vld [vmem:[%s2092_s2 + $0x28] sm:$0xff] (!%p243_p9)  ;;  %v546_v15 = vld [vmem:[%s2094_s4 + $0x10] sm:$0xff] (!%p243_p9)  ;;  %v548_v16 = vld [vmem:[%s2094_s4 + $0x20] sm:$0xff] (!%p243_p9)  ;;  %v400_v56 = vsub.s32 (!%p243_p9), 1, %v1901_v53  ;;  %v404_v57 = vsub.s32 (!%p243_p9), 3, %v1901_v53  ;;  %v334_v59 = vsub.s32 (!%p243_p9), 0, %v1901_v53  ;;  %s2048_s22 = scalar_lea.hbm (!%p243_p9), %s2097_s7, %s1520_s17 }
  0x14   : > { %v290_v17 = vld [vmem:[%s2091_s1 + $0x38] sm:$0xff] (!%p243_p9)  ;;  %v550_v18 = vld [vmem:[%s2094_s4 + $0x30] sm:$0xff] (!%p243_p9)  ;;  %v1450_v19 = vld [vmem:[%s2094_s4 + $0x40] sm:$0xff] (!%p243_p9)  ;;  %v338_v60 = vsub.s32 (!%p243_p9), 2, %v1901_v53  ;;  %s1656_s6 = smov (!%p243_p9), [#allocation3]  }
  0x15   : > { %383 = vperm.xlu0 (!%p243_p9), %1565, %v287_v3   ;;  %371 = vperm.xlu1 (!%p243_p9), %1563, %v284_v4   ;;  %v452_v20 = vld [vmem:[%s2092_s2 + $0x20] sm:$0xff] (!%p243_p9)  ;;  %v1452_v21 = vld [vmem:[%s2094_s4 + $0x50] sm:$0xff] (!%p243_p9)  ;;  %v455_v24 = vld [vmem:[%s2092_s2 + $0x38] sm:$0xff] (!%p243_p9)  ;;  %s1593_s25 = sshll.u32 (!%p243_p9), %s1656_s6, 4  ;;  %s1594_s25 = int_to_ptr.vmem [resolvable:$false] %s1593_s25 }
  0x16   : > { %v454_v22 = vld [vmem:[%s2092_s2 + $0x30] sm:$0xff] (!%p243_p9)  ;;  %v1454_v23 = vld [vmem:[%s2094_s4 + $0x60] sm:$0xff] (!%p243_p9)  ;;  %v545_v26 = vld [vmem:[%s2094_s4 + $0x8] sm:$0xff] (!%p243_p9)  ;;  %s1595_s30 = scalar_lea.vmem (!%p243_p9), %s1594_s25, 64 }
  0x17   : > { %v1456_v25 = vld [vmem:[%s2094_s4 + $0x70] sm:$0xff]  ;;  %v1474_v27 = vld [vmem:[%s2094_s4 + $0x80] sm:$0xff]  ;;  %v547_v28 = vld [vmem:[%s2094_s4 + $0x18] sm:$0xff]  ;;  %s2105_s16 = smov (!%p275_p10, %s1432_s16), 3 }
  0x18   : > { %v1476_v29 = vld [vmem:[%s2094_s4 + $0x90] sm:$0xff]  ;;  %v549_v30 = vld [vmem:[%s2094_s4 + $0x28] sm:$0xff]  ;;  %v1478_v31 = vld [vmem:[%s2094_s4 + $0xa0] sm:$0xff]  ;;  %s1433_s21 = sshll.u32 %s2105_s16, 1  ;;  %s1431_s16 = sshll.u32 %s271_s15, 1 }
  0x19   : > { %391 = vperm.xlu0 %1565, %v289_v6   ;;  %1564 = vset.pattern.permute.xlu1 %v1654_v5  ;;  %v551_v32 = vld [vmem:[%s2094_s4 + $0x38] sm:$0xff]  ;;  %v1480_v33 = vld [vmem:[%s2094_s4 + $0xb0] sm:$0xff]  ;;  %v1451_v34 = vld [vmem:[%s2094_s4 + $0x48] sm:$0xff]  ;;  %s278_s24 = scalar_lea.vmem %s2090_s0, %s1433_s21  ;;  %s273_s18 = scalar_lea.vmem [#allocation3], %s1431_s16 }
  0x1a   : > { %308 = vperm.xlu1 %1564, %v286_v7   ;;  %v1498_v35 = vld [vmem:[%s2094_s4 + $0xc0] sm:$0xff]  ;;  %v1453_v36 = vld [vmem:[%s2094_s4 + $0x58] sm:$0xff]  ;;  %v1500_v37 = vld [vmem:[%s2094_s4 + $0xd0] sm:$0xff]  ;;  %s1368_s19 = sshll.u32 %s273_s18, 4  ;;  %s2050_s19 = int_to_ptr.vmem [resolvable:$true] %s1368_s19 }
  0x1b   : > { %v1455_v38 = vld [vmem:[%s2094_s4 + $0x68] sm:$0xff]  ;;  %v1502_v39 = vld [vmem:[%s2094_s4 + $0xe0] sm:$0xff]  ;;  %v1457_v40 = vld [vmem:[%s2094_s4 + $0x78] sm:$0xff]  ;;  %p1596_p0 = scmp.lt.s32.totalorder %s2050_s19, %s1594_s25 }
  0x1c   : > { %v1504_v41 = vld [vmem:[%s2094_s4 + $0xf0] sm:$0xff]  ;;  %v1475_v42 = vld [vmem:[%s2094_s4 + $0x88] sm:$0xff]  ;;  %v1477_v43 = vld [vmem:[%s2094_s4 + $0x98] sm:$0xff] }
  0x1d   : > { %1570 = vset.pattern.permute.xlu0 %v1654_v5  ;;  %v1479_v44 = vld [vmem:[%s2094_s4 + $0xa8] sm:$0xff]  ;;  %v1481_v45 = vld [vmem:[%s2094_s4 + $0xb8] sm:$0xff]  ;;  %v282_v61 = vld [vmem:[%s278_s24] sm:$0xf]  ;;  %s1589_s24 = scalar_lea.vmem %s2050_s19, 32 }
  0x1e   : > { %293 = vperm.xlu0 %1570, %v283_v1   ;;  %1566 = vset.pattern.permute.xlu1 %v1653_v2  ;;  %v1499_v46 = vld [vmem:[%s2094_s4 + $0xc8] sm:$0xff]  ;;  %v1501_v47 = vld [vmem:[%s2094_s4 + $0xd8] sm:$0xff]  ;;  %v401_v63 = vrot.slane %v282_v61, %v400_v56  ;;  %v335_v1 = vrot.slane %v282_v61, %v334_v59  ;;  %p1590_p11 = scmp.ne.s32.totalorder %s2050_s19, %s1589_s24  ;;  %p1597_p1 = scmp.lt.s32.totalorder %s1595_s30, %s1589_s24 }
  0x1f   : > { %379 = vperm.xlu1 %1566, %v286_v7   ;;  %v1503_v48 = vld [vmem:[%s2094_s4 + $0xe8] sm:$0xff]  ;;  %v1505_v49 = vld [vmem:[%s2094_s4 + $0xf8] sm:$0xff] }
  0x20   : > { %p1591_p12 = pnand %p1590_p11, %p1738_p5  ;;  %p1598_p2 = por %p1597_p1, %p1596_p0 }
  0x22   : > { %298 = vperm.xlu0 %1570, %v284_v4   ;;  %p1592_p13 = pneg %p1591_p12 }
  0x23   : > { %1567 = vset.pattern.permute.xlu1 %v1654_v5 }
  0x24   : > { %458 = vperm.xlu1 %1567, %v448_v8   ;;  %v1918_v8 = vrot.slane %v335_v1, %v334_v59  ;;  %p1599_p3 = pnand %p1598_p2, %p1592_p13 }
  0x26   : > { %303 = vperm.xlu0 %1570, %v285_v0   ;;  %v405_v0 = vrot.slane %v282_v61, %v404_v57 }
  0x28   : > { %313 = vperm.xlu1 %1567, %v287_v3   ;;  %v1916_v7 = vrot.slane %v405_v0, %v400_v56 }
  0x2a   : > { %463 = vperm.xlu0 %1570, %v449_v9  }
  0x2c   : > { %318 = vperm.xlu1 %1567, %v288_v10  }
  0x2e   : > { %473 = vperm.xlu0 %1570, %v451_v11  }
  0x30   : > { %1568 = vset.pattern.permute.xlu1 %v1653_v2 }
  0x31   : > { %387 = vperm.xlu1 %1568, %v288_v10  }
  0x32   : > { %483 = vperm.xlu0 %1570, %v453_v12  }
  0x35   : > { %1569 = vset.pattern.permute.xlu1 %v1654_v5 }
  0x36   : > { %554 = vperm.xlu0 %1570, %v544_v13   ;;  %468 = vperm.xlu1 %1569, %v450_v14  }
  0x3a   : > { %564 = vperm.xlu0 %1570, %v546_v15   ;;  %323 = vperm.xlu1 %1569, %v289_v6   ;;  %v1914_v6 = vrot.slane %v401_v63, %v400_v56 }
  0x3e   : > { %574 = vperm.xlu0 %1570, %v548_v16   ;;  %328 = vperm.xlu1 %1569, %v290_v17  }
  0x42   : > { %584 = vperm.xlu0 %1570, %v550_v18   ;;  %1571 = vset.pattern.permute.xlu1 %v1653_v2  ;;  %v339_v2 = vrot.slane %v282_v61, %v338_v60 }
  0x43   : > { %395 = vperm.xlu1 %1571, %v290_v17  }
  0x44   : > { %v1920_v9 = vrot.slane %v339_v2, %v334_v59 }
  0x46   : > { %742 = vperm.xlu0 %1570, %v1450_v19  }
  0x47   : > { %1572 = vset.pattern.permute.xlu1 %v1654_v5 }
  0x48   : > { %478 = vperm.xlu1 %1572, %v452_v20  }
  0x4a   : > { %752 = vperm.xlu0 %1570, %v1452_v21  }
  0x4c   : > { %488 = vperm.xlu1 %1572, %v454_v22  }
  0x4e   : > { %762 = vperm.xlu0 %1570, %v1454_v23  }
  0x50   : > { %493 = vperm.xlu1 %1572, %v455_v24  }
  0x52   : > { %772 = vperm.xlu0 %1570, %v1456_v25  }
  0x54   : > { %559 = vperm.xlu1 %1572, %v545_v26  }
  0x56   : > { %929 = vperm.xlu0 %1570, %v1474_v27  }
  0x58   : > { %569 = vperm.xlu1 %1572, %v547_v28  }
  0x5a   : > { %939 = vperm.xlu0 %1570, %v1476_v29  }
  0x5c   : > { %579 = vperm.xlu1 %1572, %v549_v30  }
  0x5e   : > { %949 = vperm.xlu0 %1570, %v1478_v31  }
  0x60   : > { %589 = vperm.xlu1 %1572, %v551_v32  }
  0x62   : > { %959 = vperm.xlu0 %1570, %v1480_v33  }
  0x64   : > { %747 = vperm.xlu1 %1572, %v1451_v34  }
  0x66   : > { %1116 = vperm.xlu0 %1570, %v1498_v35  }
  0x68   : > { %757 = vperm.xlu1 %1572, %v1453_v36  }
  0x6a   : > { %1126 = vperm.xlu0 %1570, %v1500_v37  }
  0x6c   : > { %767 = vperm.xlu1 %1572, %v1455_v38  }
  0x6e   : > { %1136 = vperm.xlu0 %1570, %v1502_v39  }
  0x70   : > { %777 = vperm.xlu1 %1572, %v1457_v40  }
  0x72   : > { %1146 = vperm.xlu0 %1570, %v1504_v41  }
  0x74   : > { %934 = vperm.xlu1 %1572, %v1475_v42  }
  0x78   : > { %944 = vperm.xlu1 %1572, %v1477_v43  }
  0x7c   : > { %954 = vperm.xlu1 %1572, %v1479_v44  }
  0x80   : > { %964 = vperm.xlu1 %1572, %v1481_v45  }
  0x84   : > { %1121 = vperm.xlu1 %1572, %v1499_v46  }
  0x88   : > { %1131 = vperm.xlu1 %1572, %v1501_v47  }
  0x8c   : > { %1141 = vperm.xlu1 %1572, %v1503_v48  }
  0x90   : > { %1151 = vperm.xlu1 %1572, %v1505_v49   ;;  %v368_v51 = vpop.permute.xlu1 %367  ;;  %v376_v52 = vpop.permute.xlu0 %375 }
  0x91   : > { %v416_v14 = vmul.f32 %v1914_v6, %v368_v51  ;;  %v417_v15 = vmul.f32 %v1916_v7, %v368_v51  ;;  %v420_v40 = vmul.f32 %v1914_v6, %v376_v52  ;;  %v421_v41 = vmul.f32 %v1916_v7, %v376_v52 }
  0x94   : > { %v372_v54 = vpop.permute.xlu1 %371  ;;  %v1903_v55 = vpop.permute.xlu0 %383 }
  0x95   : > { %v418_v19 = vmul.f32 %v1914_v6, %v372_v54  ;;  %v419_v20 = vmul.f32 %v1916_v7, %v372_v54 }
  0x98   : > { %v1910_v58 = vpop.permute.xlu0 %391 }
  0x99   : > { %v309_v62 = vpop.permute.xlu1 %308 }
  0x9a   : > { %v356_v42 = vmul.f32 %v1918_v8, %v309_v62  ;;  %v357_v43 = vmul.f32 %v1920_v9, %v309_v62 }
  0x9d   : > { %v294_v3 = vpop.permute.xlu0 %293 }
  0x9e   : > { %v380_v4 = vpop.permute.xlu1 %379  ;;  %v350_v11 = vmul.f32 %v1918_v8, %v294_v3  ;;  %v351_v12 = vmul.f32 %v1920_v9, %v294_v3 }
  0x9f   : > { %v422_v36 = vmul.f32 %v1914_v6, %v380_v4  ;;  %v423_v37 = vmul.f32 %v1916_v7, %v380_v4 }
  0xa0   : > { %v432_v21 = vadd.f32 %v416_v14, %v350_v11  ;;  %v433_v22 = vadd.f32 %v417_v15, %v351_v12 }
  0xa1   : > { %v299_v10 = vpop.permute.xlu0 %298  ;;  %v438_v48 = vadd.f32 %v422_v36, %v356_v42  ;;  %v439_v49 = vadd.f32 %v423_v37, %v357_v43 }
  0xa2   : > { %v352_v16 = vmul.f32 %v1918_v8, %v299_v10  ;;  %v353_v17 = vmul.f32 %v1920_v9, %v299_v10 }
  0xa3   : > { %v459_v13 = vpop.permute.xlu1 %458 }
  0xa4   : > { %v496_v24 = vadd.f32 %v459_v13, %v432_v21  ;;  %v497_v25 = vadd.f32 %v459_v13, %v433_v22  ;;  %v434_v26 = vadd.f32 %v418_v19, %v352_v16  ;;  %v435_v27 = vadd.f32 %v419_v20, %v353_v17 }
  0xa5   : > { %v304_v18 = vpop.permute.xlu0 %303  ;;  %v424_v16 = vmul.f32 %v1914_v6, %v1903_v55  ;;  %v425_v17 = vmul.f32 %v1916_v7, %v1903_v55  ;;  %v428_v55 = vmul.f32 %v1914_v6, %v1910_v58 }
  0xa6   : > { %v512_v32 = vmax.f32 %v496_v24, 0.0  ;;  %v513_v34 = vmax.f32 %v497_v25, 0.0  ;;  %v354_v44 = vmul.f32 %v1918_v8, %v304_v18  ;;  %v355_v45 = vmul.f32 %v1920_v9, %v304_v18 }
  0xa7   : > { %v314_v23 = vpop.permute.xlu1 %313 }
  0xa8   : > { %v436_v56 = vadd.f32 %v420_v40, %v354_v44  ;;  %v437_v57 = vadd.f32 %v421_v41, %v355_v45  ;;  %v358_v18 = vmul.f32 %v1918_v8, %v314_v23  ;;  %v359_v19 = vmul.f32 %v1920_v9, %v314_v23 }
  0xa9   : > { %v464_v28 = vpop.permute.xlu0 %463 }
  0xaa   : > { %v498_v29 = vadd.f32 %v464_v28, %v434_v26  ;;  %v499_v30 = vadd.f32 %v464_v28, %v435_v27  ;;  %v440_v25 = vadd.f32 %v424_v16, %v358_v18  ;;  %v441_v26 = vadd.f32 %v425_v17, %v359_v19 }
  0xab   : > { %v319_v31 = vpop.permute.xlu1 %318 }
  0xac   : > { %v514_v33 = vmax.f32 %v498_v29, 0.0  ;;  %v515_v35 = vmax.f32 %v499_v30, 0.0  ;;  %v360_v12 = vmul.f32 %v1918_v8, %v319_v31  ;;  %v361_v13 = vmul.f32 %v1920_v9, %v319_v31 }
  0xad   : > { %v474_v47 = vpop.permute.xlu0 %473 }
  0xae   : > { %v537_v38 = vpack.c.bf16 %v515_v35, %v513_v34  ;;  %v536_v39 = vpack.c.bf16 %v514_v33, %v512_v32  ;;  %v502_v51 = vadd.f32 %v474_v47, %v438_v48  ;;  %v503_v54 = vadd.f32 %v474_v47, %v439_v49 }
  0xaf   : > { %v429_v32 = vmul.f32 %v1916_v7, %v1910_v58 }
  0xb0   : > { %v388_v46 = vpop.permute.xlu1 %387  ;;  %625 = vmatprep.subr.bf16.mxu0 %v537_v38  ;;  %v518_v61 = vmax.f32 %v502_v51, 0.0  ;;  %v519_v63 = vmax.f32 %v503_v54, 0.0 }
  0xb1   : > { %626 = vmatpush1.bf16.msra.mxu0 %v536_v39  ;;  %v426_v4 = vmul.f32 %v1914_v6, %v388_v46  ;;  %v427_v10 = vmul.f32 %v1916_v7, %v388_v46  ;;  %v484_v21 = vpop.permute.xlu0 %483 }
  0xb3   : > { %v442_v14 = vadd.f32 %v426_v4, %v360_v12  ;;  %v443_v15 = vadd.f32 %v427_v10, %v361_v13 }
  0xb5   : > { %v469_v59 = vpop.permute.xlu1 %468  ;;  %v506_v22 = vadd.f32 %v484_v21, %v442_v14  ;;  %v507_v24 = vadd.f32 %v484_v21, %v443_v15 }
  0xb6   : > { %v500_v52 = vadd.f32 %v469_v59, %v436_v56  ;;  %v501_v60 = vadd.f32 %v469_v59, %v437_v57 }
  0xb7   : > { %v522_v23 = vmax.f32 %v506_v22, 0.0  ;;  %v523_v33 = vmax.f32 %v507_v24, 0.0 }
  0xb8   : > { %v516_v62 = vmax.f32 %v500_v52, 0.0  ;;  %v517_v0 = vmax.f32 %v501_v60, 0.0  ;;  %v1575_v52 = vld [vmem:[%s2093_s3 + $0x10] sm:$0xff]   ;;  %v1576_v60 = vld [vmem:[%s2093_s3 + $0x18] sm:$0xff]  }
  0xb9   : > { %v324_v1 = vpop.permute.xlu1 %323 }
  0xba   : > { %v539_v2 = vpack.c.bf16 %v519_v63, %v517_v0  ;;  %v538_v3 = vpack.c.bf16 %v518_v61, %v516_v62  ;;  %v362_v27 = vmul.f32 %v1918_v8, %v324_v1  ;;  %v363_v28 = vmul.f32 %v1920_v9, %v324_v1  ;;  %v555_v61 = vpop.permute.xlu0 %554 }
  0xbc   : > { %627 = vmatprep.subr.bf16.mxu0 %v539_v2  ;;  %v444_v39 = vadd.f32 %v428_v55, %v362_v27  ;;  %v445_v40 = vadd.f32 %v429_v32, %v363_v28 }
  0xbd   : > { %v329_v11 = vpop.permute.xlu1 %328  ;;  %628 = vmatpush1.bf16.msra.mxu0 %v538_v3 }
  0xbe   : > { %v364_v41 = vmul.f32 %v1918_v8, %v329_v11  ;;  %v365_v42 = vmul.f32 %v1920_v9, %v329_v11  ;;  %v1573_v8 = vld [vmem:[%s2093_s3] sm:$0xff]   ;;  %v1574_v9 = vld [vmem:[%s2093_s3 + $0x8] sm:$0xff]   ;;  %v565_v17 = vpop.permute.xlu0 %564 }
  0xc2   : > { %v396_v20 = vpop.permute.xlu1 %395 }
  0xc3   : > { %v430_v34 = vmul.f32 %v1914_v6, %v396_v20  ;;  %v431_v35 = vmul.f32 %v1916_v7, %v396_v20 }
  0xc5   : > { %v446_v58 = vadd.f32 %v430_v34, %v364_v41  ;;  %v447_v47 = vadd.f32 %v431_v35, %v365_v42 }
  0xc7   : > { %v479_v29 = vpop.permute.xlu1 %478 }
  0xc8   : > { %v504_v30 = vadd.f32 %v479_v29, %v440_v25  ;;  %v505_v31 = vadd.f32 %v479_v29, %v441_v26 }
  0xca   : > { %v520_v36 = vmax.f32 %v504_v30, 0.0  ;;  %v521_v37 = vmax.f32 %v505_v31, 0.0 }
  0xcb   : > { %v489_v38 = vpop.permute.xlu1 %488 }
  0xcc   : > { %v541_v43 = vpack.c.bf16 %v523_v33, %v521_v37  ;;  %v540_v44 = vpack.c.bf16 %v522_v23, %v520_v36  ;;  %v508_v45 = vadd.f32 %v489_v38, %v444_v39  ;;  %v509_v46 = vadd.f32 %v489_v38, %v445_v40  ;;  %v575_v23 = vpop.permute.xlu0 %574 }
  0xce   : > { %629 = vmatprep.subr.bf16.mxu0 %v541_v43  ;;  %v524_v49 = vmax.f32 %v508_v45, 0.0  ;;  %v525_v51 = vmax.f32 %v509_v46, 0.0 }
  0xcf   : > { %v494_v48 = vpop.permute.xlu1 %493  ;;  %630 = vmatpush1.bf16.msra.mxu0 %v540_v44 }
  0xd0   : > { %v510_v6 = vadd.f32 %v494_v48, %v446_v58  ;;  %v511_v7 = vadd.f32 %v494_v48, %v447_v47  ;;  %v585_v47 = vpop.permute.xlu0 %584 }
  0xd2   : > { %v526_v54 = vmax.f32 %v510_v6, 0.0  ;;  %v527_v56 = vmax.f32 %v511_v7, 0.0 }
  0xd3   : > { %v560_v1 = vpop.permute.xlu1 %559 }
  0xd4   : > { %v543_v57 = vpack.c.bf16 %v527_v56, %v525_v51  ;;  %v542_v59 = vpack.c.bf16 %v526_v54, %v524_v49 }
  0xd6   : > { %631 = vmatprep.subr.bf16.mxu0 %v543_v57 }
  0xd7   : > { %632 = vmatpush1.bf16.msra.mxu0 %v542_v59  ;;  %v570_v22 = vpop.permute.xlu1 %569 }
  0xda   : > { %1438 = vmatmul.mubr.msk.bf16.vlgmr.msra.gmra.mrb[0].mxu0 %vm612_vm0, %v1573_v8 }
  0xdb   : > { %667 = vmatprep.mubr.bf16.mxu0 %v1654_v5  ;;  %v580_v37 = vpop.permute.xlu1 %579 }
  0xdf   : > { %v590_v51 = vpop.permute.xlu1 %589 }
  0xe2   : > { %1439 = vmatmul.mubr.msk.bf16.gmra.mrb[4].mxu0 %vm612_vm0, %v1574_v9 }
  0xe3   : > { %677 = vmatprep.mubr.bf16.mxu0 %v1654_v5 }
  0xea   : > { %1440 = vmatmul.mubr.msk.bf16.gmra.mrb[8].mxu0 %vm612_vm0, %v1575_v52 }
  0xeb   : > { %687 = vmatprep.mubr.bf16.mxu0 %v1654_v5 }
  0xf2   : > { %1441 = vmatmul.mubr.msk.bf16.gmra.mrb[12].mxu0 %vm612_vm0, %v1576_v60 }
  0xf3   : > { %1031 = vmatprep.mubr.bf16.mxu0 %v1654_v5 }
 0x1ad   : > { %v659_v63 = vpop.f32.mrb[0].mxu0 }
 0x1ae   : > { %v660_v62 = vadd.f32 %v659_v63, %v555_v61  ;;  %v661_v0 = vpop.f32.mrb[1].mxu0 }
 0x1af   : > { %v662_v2 = vadd.f32 %v661_v0, %v555_v61  ;;  %v663_v3 = vpop.f32.mrb[2].mxu0  ;;  %v1577_v0 = vld [vmem:[%s2093_s3 + $0x20] sm:$0xff]  }
 0x1b0   : > { %v664_v4 = vadd.f32 %v663_v3, %v560_v1  ;;  %v665_v10 = vpop.f32.mrb[3].mxu0  ;;  %v698_v12 = vmax.f32 %v660_v62, 0.0  ;;  %v1580_v3 = vld [vmem:[%s2093_s3 + $0x38] sm:$0xff]  }
 0x1b1   : > { %v666_v11 = vadd.f32 %v665_v10, %v560_v1  ;;  %v699_v14 = vmax.f32 %v662_v2, 0.0  ;;  %v1578_v1 = vld [vmem:[%s2093_s3 + $0x28] sm:$0xff]   ;;  %v1579_v2 = vld [vmem:[%s2093_s3 + $0x30] sm:$0xff]  }
 0x1b2   : > { %v700_v13 = vmax.f32 %v664_v4, 0.0  ;;  %v743_v4 = vpop.permute.xlu0 %742 }
 0x1b3   : > { %v701_v15 = vmax.f32 %v666_v11, 0.0 }
 0x1b4   : > { %v723_v16 = vpack.c.bf16 %v700_v13, %v698_v12  ;;  %v748_v13 = vpop.permute.xlu1 %747 }
 0x1b5   : > { %v669_v18 = vpop.f32.mrb[4].mxu0  ;;  %v724_v19 = vpack.c.bf16 %v701_v15, %v699_v14 }
 0x1b6   : > { %v670_v20 = vadd.f32 %v669_v18, %v565_v17  ;;  %v671_v21 = vpop.f32.mrb[5].mxu0 }
 0x1b7   : > { %v672_v24 = vadd.f32 %v671_v21, %v565_v17  ;;  %v673_v25 = vpop.f32.mrb[6].mxu0  ;;  %812 = vmatprep.subr.bf16.mxu1 %v724_v19 }
 0x1b8   : > { %v674_v26 = vadd.f32 %v673_v25, %v570_v22  ;;  %v675_v27 = vpop.f32.mrb[7].mxu0  ;;  %813 = vmatpush1.bf16.msra.mxu1 %v723_v16  ;;  %v702_v29 = vmax.f32 %v670_v20, 0.0  ;;  %v753_v25 = vpop.permute.xlu0 %752 }
 0x1b9   : > { %v676_v28 = vadd.f32 %v675_v27, %v570_v22  ;;  %v703_v31 = vmax.f32 %v672_v24, 0.0 }
 0x1ba   : > { %v704_v30 = vmax.f32 %v674_v26, 0.0 }
 0x1bb   : > { %v705_v55 = vmax.f32 %v676_v28, 0.0 }
 0x1bc   : > { %v725_v32 = vpack.c.bf16 %v704_v30, %v702_v29  ;;  %v758_v30 = vpop.permute.xlu1 %757 }
 0x1bd   : > { %v726_v33 = vpack.c.bf16 %v705_v55, %v703_v31  ;;  %v679_v34 = vpop.f32.mrb[8].mxu0 }
 0x1be   : > { %v680_v35 = vadd.f32 %v679_v34, %v575_v23  ;;  %v681_v36 = vpop.f32.mrb[9].mxu0 }
 0x1bf   : > { %v682_v38 = vadd.f32 %v681_v36, %v575_v23  ;;  %v683_v39 = vpop.f32.mrb[10].mxu0  ;;  %814 = vmatprep.subr.bf16.mxu1 %v726_v33 }
 0x1c0   : > { %v684_v40 = vadd.f32 %v683_v39, %v580_v37  ;;  %v685_v41 = vpop.f32.mrb[11].mxu0  ;;  %815 = vmatpush1.bf16.msra.mxu1 %v725_v32  ;;  %v706_v43 = vmax.f32 %v680_v35, 0.0  ;;  %v763_v39 = vpop.permute.xlu0 %762 }
 0x1c1   : > { %v686_v42 = vadd.f32 %v685_v41, %v580_v37  ;;  %v707_v45 = vmax.f32 %v682_v38, 0.0 }
 0x1c2   : > { %v708_v44 = vmax.f32 %v684_v40, 0.0 }
 0x1c3   : > { %v709_v46 = vmax.f32 %v686_v42, 0.0 }
 0x1c4   : > { %v727_v58 = vpack.c.bf16 %v708_v44, %v706_v43  ;;  %v768_v44 = vpop.permute.xlu1 %767 }
 0x1c5   : > { %v728_v48 = vpack.c.bf16 %v709_v46, %v707_v45  ;;  %v689_v6 = vpop.f32.mrb[12].mxu0 }
 0x1c6   : > { %v690_v7 = vadd.f32 %v689_v6, %v585_v47  ;;  %v691_v49 = vpop.f32.mrb[13].mxu0 }
 0x1c7   : > { %v692_v54 = vadd.f32 %v691_v49, %v585_v47  ;;  %v693_v56 = vpop.f32.mrb[14].mxu0  ;;  %816 = vmatprep.subr.bf16.mxu1 %v728_v48 }
 0x1c8   : > { %v694_v57 = vadd.f32 %v693_v56, %v590_v51  ;;  %v695_v59 = vpop.f32.mrb[15].mxu0  ;;  %817 = vmatpush1.bf16.msra.mxu1 %v727_v58  ;;  %v710_v9 = vmax.f32 %v690_v7, 0.0  ;;  %v773_v56 = vpop.permute.xlu0 %772 }
 0x1c9   : > { %v696_v8 = vadd.f32 %v695_v59, %v590_v51  ;;  %v711_v60 = vmax.f32 %v692_v54, 0.0 }
 0x1ca   : > { %v712_v52 = vmax.f32 %v694_v57, 0.0 }
 0x1cb   : > { %v713_v61 = vmax.f32 %v696_v8, 0.0 }
 0x1cc   : > { %v729_v63 = vpack.c.bf16 %v712_v52, %v710_v9  ;;  %v778_v52 = vpop.permute.xlu1 %777 }
 0x1cd   : > { %v730_v62 = vpack.c.bf16 %v713_v61, %v711_v60 }
 0x1cf   : > { %818 = vmatprep.subr.bf16.mxu1 %v730_v62 }
 0x1d0   : > { %819 = vmatpush1.bf16.msra.mxu1 %v729_v63 }
 0x1d3   : > { %1462 = vmatmul.mubr.msk.bf16.vlgmr.msra.gmra.mrb[0].mxu1 %vm612_vm0, %v1577_v0 }
 0x1d4   : > { %854 = vmatprep.mubr.bf16.mxu1 %v1654_v5 }
 0x1db   : > { %1463 = vmatmul.mubr.msk.bf16.gmra.mrb[4].mxu1 %vm612_vm0, %v1578_v1 }
 0x1dc   : > { %864 = vmatprep.mubr.bf16.mxu1 %v1654_v5 }
 0x1e3   : > { %1464 = vmatmul.mubr.msk.bf16.gmra.mrb[8].mxu1 %vm612_vm0, %v1579_v2 }
 0x1e4   : > { %874 = vmatprep.mubr.bf16.mxu1 %v1654_v5 }
 0x1eb   : > { %1465 = vmatmul.mubr.msk.bf16.gmra.mrb[12].mxu1 %vm612_vm0, %v1580_v3 }
 0x1ec   : > { %1218 = vmatprep.mubr.bf16.mxu1 %v1654_v5 }
 0x2a6   : > { %v846_v10 = vpop.f32.mrb[0].mxu1 }
 0x2a7   : > { %v847_v11 = vadd.f32 %v846_v10, %v743_v4  ;;  %v848_v12 = vpop.f32.mrb[1].mxu1 }
 0x2a8   : > { %v849_v14 = vadd.f32 %v848_v12, %v743_v4  ;;  %v850_v15 = vpop.f32.mrb[2].mxu1  ;;  %v1581_v12 = vld [vmem:[%s2093_s3 + $0x40] sm:$0xff]  }
 0x2a9   : > { %v851_v16 = vadd.f32 %v850_v15, %v748_v13  ;;  %v852_v17 = vpop.f32.mrb[3].mxu1  ;;  %v885_v19 = vmax.f32 %v847_v11, 0.0  ;;  %v1584_v15 = vld [vmem:[%s2093_s3 + $0x58] sm:$0xff]  }
 0x2aa   : > { %v853_v18 = vadd.f32 %v852_v17, %v748_v13  ;;  %v886_v21 = vmax.f32 %v849_v14, 0.0  ;;  %v1582_v13 = vld [vmem:[%s2093_s3 + $0x48] sm:$0xff]   ;;  %v1583_v14 = vld [vmem:[%s2093_s3 + $0x50] sm:$0xff]  }
 0x2ab   : > { %v887_v20 = vmax.f32 %v851_v16, 0.0  ;;  %v930_v16 = vpop.permute.xlu0 %929 }
 0x2ac   : > { %v888_v22 = vmax.f32 %v853_v18, 0.0 }
 0x2ad   : > { %v910_v24 = vpack.c.bf16 %v887_v20, %v885_v19  ;;  %v935_v20 = vpop.permute.xlu1 %934 }
 0x2ae   : > { %v911_v26 = vpack.c.bf16 %v888_v22, %v886_v21  ;;  %v856_v27 = vpop.f32.mrb[4].mxu1 }
 0x2af   : > { %v857_v28 = vadd.f32 %v856_v27, %v753_v25  ;;  %v858_v29 = vpop.f32.mrb[5].mxu1 }
 0x2b0   : > { %v859_v31 = vadd.f32 %v858_v29, %v753_v25  ;;  %v860_v55 = vpop.f32.mrb[6].mxu1  ;;  %999 = vmatprep.subr.bf16.mxu0 %v911_v26 }
 0x2b1   : > { %v861_v32 = vadd.f32 %v860_v55, %v758_v30  ;;  %v862_v23 = vpop.f32.mrb[7].mxu1  ;;  %1000 = vmatpush1.bf16.msra.mxu0 %v910_v24  ;;  %v889_v34 = vmax.f32 %v857_v28, 0.0  ;;  %v940_v55 = vpop.permute.xlu0 %939 }
 0x2b2   : > { %v863_v33 = vadd.f32 %v862_v23, %v758_v30  ;;  %v890_v36 = vmax.f32 %v859_v31, 0.0 }
 0x2b3   : > { %v891_v35 = vmax.f32 %v861_v32, 0.0 }
 0x2b4   : > { %v892_v37 = vmax.f32 %v863_v33, 0.0 }
 0x2b5   : > { %v912_v38 = vpack.c.bf16 %v891_v35, %v889_v34  ;;  %v945_v35 = vpop.permute.xlu1 %944 }
 0x2b6   : > { %v913_v40 = vpack.c.bf16 %v892_v37, %v890_v36  ;;  %v866_v41 = vpop.f32.mrb[8].mxu1 }
 0x2b7   : > { %v867_v42 = vadd.f32 %v866_v41, %v763_v39  ;;  %v868_v43 = vpop.f32.mrb[9].mxu1 }
 0x2b8   : > { %v869_v45 = vadd.f32 %v868_v43, %v763_v39  ;;  %v870_v46 = vpop.f32.mrb[10].mxu1  ;;  %1001 = vmatprep.subr.bf16.mxu0 %v913_v40 }
 0x2b9   : > { %v871_v58 = vadd.f32 %v870_v46, %v768_v44  ;;  %v872_v47 = vpop.f32.mrb[11].mxu1  ;;  %1002 = vmatpush1.bf16.msra.mxu0 %v912_v38  ;;  %v893_v6 = vmax.f32 %v867_v42, 0.0  ;;  %v950_v46 = vpop.permute.xlu0 %949 }
 0x2ba   : > { %v873_v48 = vadd.f32 %v872_v47, %v768_v44  ;;  %v894_v49 = vmax.f32 %v869_v45, 0.0 }
 0x2bb   : > { %v895_v7 = vmax.f32 %v871_v58, 0.0 }
 0x2bc   : > { %v896_v51 = vmax.f32 %v873_v48, 0.0 }
 0x2bd   : > { %v914_v54 = vpack.c.bf16 %v895_v7, %v893_v6  ;;  %v955_v7 = vpop.permute.xlu1 %954 }
 0x2be   : > { %v915_v57 = vpack.c.bf16 %v896_v51, %v894_v49  ;;  %v876_v59 = vpop.f32.mrb[12].mxu1 }
 0x2bf   : > { %v877_v8 = vadd.f32 %v876_v59, %v773_v56  ;;  %v878_v9 = vpop.f32.mrb[13].mxu1 }
 0x2c0   : > { %v879_v60 = vadd.f32 %v878_v9, %v773_v56  ;;  %v880_v61 = vpop.f32.mrb[14].mxu1  ;;  %1003 = vmatprep.subr.bf16.mxu0 %v915_v57 }
 0x2c1   : > { %v881_v63 = vadd.f32 %v880_v61, %v778_v52  ;;  %v882_v62 = vpop.f32.mrb[15].mxu1  ;;  %1004 = vmatpush1.bf16.msra.mxu0 %v914_v54  ;;  %v897_v1 = vmax.f32 %v877_v8, 0.0  ;;  %v960_v61 = vpop.permute.xlu0 %959 }
 0x2c2   : > { %v883_v0 = vadd.f32 %v882_v62, %v778_v52  ;;  %v898_v3 = vmax.f32 %v879_v60, 0.0 }
 0x2c3   : > { %v899_v2 = vmax.f32 %v881_v63, 0.0 }
 0x2c4   : > { %v900_v4 = vmax.f32 %v883_v0, 0.0 }
 0x2c5   : > { %v916_v10 = vpack.c.bf16 %v899_v2, %v897_v1  ;;  %v965_v2 = vpop.permute.xlu1 %964 }
 0x2c6   : > { %v917_v11 = vpack.c.bf16 %v900_v4, %v898_v3 }
 0x2c8   : > { %1005 = vmatprep.subr.bf16.mxu0 %v917_v11 }
 0x2c9   : > { %1006 = vmatpush1.bf16.msra.mxu0 %v916_v10 }
 0x2cc   : > { %1486 = vmatmul.mubr.msk.bf16.vlgmr.msra.gmra.mrb[16].mxu0 %vm612_vm0, %v1581_v12 }
 0x2cd   : > { %1041 = vmatprep.mubr.bf16.mxu0 %v1654_v5 }
 0x2d4   : > { %1487 = vmatmul.mubr.msk.bf16.gmra.mrb[20].mxu0 %vm612_vm0, %v1582_v13 }
 0x2d5   : > { %1051 = vmatprep.mubr.bf16.mxu0 %v1654_v5 }
 0x2dc   : > { %1488 = vmatmul.mubr.msk.bf16.gmra.mrb[24].mxu0 %vm612_vm0, %v1583_v14 }
 0x2dd   : > { %1061 = vmatprep.mubr.bf16.mxu0 %v1654_v5 }
 0x2e4   : > { %1489 = vmatmul.mubr.msk.bf16.gmra.mrb[28].mxu0 %vm612_vm0, %v1584_v15 }
 0x2e5   : > { %1321 = vmatprep.mubr.bf16.mxu0 %v1654_v5 }
 0x39f   : > { %v1033_v17 = vpop.f32.mrb[16].mxu0 }
 0x3a0   : > { %v1034_v18 = vadd.f32 %v1033_v17, %v930_v16  ;;  %v1035_v19 = vpop.f32.mrb[17].mxu0 }
 0x3a1   : > { %v1036_v21 = vadd.f32 %v1035_v19, %v930_v16  ;;  %v1037_v22 = vpop.f32.mrb[18].mxu0  ;;  %v1585_v19 = vld [vmem:[%s2093_s3 + $0x60] sm:$0xff]  }
 0x3a2   : > { %v1038_v24 = vadd.f32 %v1037_v22, %v935_v20  ;;  %v1039_v25 = vpop.f32.mrb[19].mxu0  ;;  %v1072_v27 = vmax.f32 %v1034_v18, 0.0  ;;  %v1588_v22 = vld [vmem:[%s2093_s3 + $0x78] sm:$0xff]  }
 0x3a3   : > { %v1040_v26 = vadd.f32 %v1039_v25, %v935_v20  ;;  %v1073_v29 = vmax.f32 %v1036_v21, 0.0  ;;  %v1586_v20 = vld [vmem:[%s2093_s3 + $0x68] sm:$0xff]   ;;  %v1587_v21 = vld [vmem:[%s2093_s3 + $0x70] sm:$0xff]  }
 0x3a4   : > { %v1074_v28 = vmax.f32 %v1038_v24, 0.0  ;;  %v1117_v24 = vpop.permute.xlu0 %1116 }
 0x3a5   : > { %v1075_v30 = vmax.f32 %v1040_v26, 0.0 }
 0x3a6   : > { %v1097_v31 = vpack.c.bf16 %v1074_v28, %v1072_v27  ;;  %v1122_v28 = vpop.permute.xlu1 %1121 }
 0x3a7   : > { %v1098_v32 = vpack.c.bf16 %v1075_v30, %v1073_v29  ;;  %v1043_v23 = vpop.f32.mrb[20].mxu0 }
 0x3a8   : > { %v1044_v33 = vadd.f32 %v1043_v23, %v940_v55  ;;  %v1045_v34 = vpop.f32.mrb[21].mxu0 }
 0x3a9   : > { %v1046_v36 = vadd.f32 %v1045_v34, %v940_v55  ;;  %v1047_v37 = vpop.f32.mrb[22].mxu0  ;;  %1186 = vmatprep.subr.bf16.mxu1 %v1098_v32 }
 0x3aa   : > { %v1048_v38 = vadd.f32 %v1047_v37, %v945_v35  ;;  %v1049_v39 = vpop.f32.mrb[23].mxu0  ;;  %1187 = vmatpush1.bf16.msra.mxu1 %v1097_v31  ;;  %v1076_v41 = vmax.f32 %v1044_v33, 0.0 }
 0x3ab   : > { %v1050_v40 = vadd.f32 %v1049_v39, %v945_v35  ;;  %v1077_v43 = vmax.f32 %v1046_v36, 0.0  ;;  %v1127_v36 = vpop.permute.xlu0 %1126 }
 0x3ac   : > { %v1078_v42 = vmax.f32 %v1048_v38, 0.0 }
 0x3ad   : > { %v1079_v44 = vmax.f32 %v1050_v40, 0.0 }
 0x3ae   : > { %v1099_v45 = vpack.c.bf16 %v1078_v42, %v1076_v41  ;;  %v1132_v41 = vpop.permute.xlu1 %1131 }
 0x3af   : > { %v1100_v58 = vpack.c.bf16 %v1079_v44, %v1077_v43  ;;  %v1053_v47 = vpop.f32.mrb[24].mxu0 }
 0x3b0   : > { %v1054_v48 = vadd.f32 %v1053_v47, %v950_v46  ;;  %v1055_v6 = vpop.f32.mrb[25].mxu0 }
 0x3b1   : > { %v1056_v49 = vadd.f32 %v1055_v6, %v950_v46  ;;  %v1057_v51 = vpop.f32.mrb[26].mxu0  ;;  %1188 = vmatprep.subr.bf16.mxu1 %v1100_v58 }
 0x3b2   : > { %v1058_v54 = vadd.f32 %v1057_v51, %v955_v7  ;;  %v1059_v56 = vpop.f32.mrb[27].mxu0  ;;  %1189 = vmatpush1.bf16.msra.mxu1 %v1099_v45  ;;  %v1080_v59 = vmax.f32 %v1054_v48, 0.0 }
 0x3b3   : > { %v1060_v57 = vadd.f32 %v1059_v56, %v955_v7  ;;  %v1081_v9 = vmax.f32 %v1056_v49, 0.0  ;;  %v1137_v49 = vpop.permute.xlu0 %1136 }
 0x3b4   : > { %v1082_v8 = vmax.f32 %v1058_v54, 0.0 }
 0x3b5   : > { %v1083_v52 = vmax.f32 %v1060_v57, 0.0 }
 0x3b6   : > { %v1101_v60 = vpack.c.bf16 %v1082_v8, %v1080_v59  ;;  %v1142_v59 = vpop.permute.xlu1 %1141 }
 0x3b7   : > { %v1102_v63 = vpack.c.bf16 %v1083_v52, %v1081_v9  ;;  %v1063_v62 = vpop.f32.mrb[28].mxu0 }
 0x3b8   : > { %v1064_v0 = vadd.f32 %v1063_v62, %v960_v61  ;;  %v1065_v1 = vpop.f32.mrb[29].mxu0 }
 0x3b9   : > { %v1066_v3 = vadd.f32 %v1065_v1, %v960_v61  ;;  %v1067_v4 = vpop.f32.mrb[30].mxu0  ;;  %1190 = vmatprep.subr.bf16.mxu1 %v1102_v63 }
 0x3ba   : > { %v1068_v10 = vadd.f32 %v1067_v4, %v965_v2  ;;  %v1069_v11 = vpop.f32.mrb[31].mxu0  ;;  %1191 = vmatpush1.bf16.msra.mxu1 %v1101_v60  ;;  %v1084_v13 = vmax.f32 %v1064_v0, 0.0 }
 0x3bb   : > { %v1070_v12 = vadd.f32 %v1069_v11, %v965_v2  ;;  %v1085_v15 = vmax.f32 %v1066_v3, 0.0  ;;  %v1147_v3 = vpop.permute.xlu0 %1146 }
 0x3bc   : > { %v1086_v14 = vmax.f32 %v1068_v10, 0.0 }
 0x3bd   : > { %v1087_v16 = vmax.f32 %v1070_v12, 0.0 }
 0x3be   : > { %v1103_v17 = vpack.c.bf16 %v1086_v14, %v1084_v13  ;;  %v1152_v13 = vpop.permute.xlu1 %1151 }
 0x3bf   : > { %v1104_v18 = vpack.c.bf16 %v1087_v16, %v1085_v15 }
 0x3c1   : > { %1192 = vmatprep.subr.bf16.mxu1 %v1104_v18 }
 0x3c2   : > { %1193 = vmatpush1.bf16.msra.mxu1 %v1103_v17 }
 0x3c5   : > { %1510 = vmatmul.mubr.msk.bf16.vlgmr.msra.gmra.mrb[16].mxu1 %vm612_vm0, %v1585_v19 }
 0x3c6   : > { %1228 = vmatprep.mubr.bf16.mxu1 %v1654_v5 }
 0x3cd   : > { %1511 = vmatmul.mubr.msk.bf16.gmra.mrb[20].mxu1 %vm612_vm0, %v1586_v20 }
 0x3ce   : > { %1238 = vmatprep.mubr.bf16.mxu1 %v1654_v5 }
 0x3d5   : > { %1512 = vmatmul.mubr.msk.bf16.gmra.mrb[24].mxu1 %vm612_vm0, %v1587_v21 }
 0x3d6   : > { %1248 = vmatprep.mubr.bf16.mxu1 %v1654_v5 }
 0x3dd   : > { %1513 = vmatmul.mubr.msk.bf16.gmra.mrb[28].mxu1 %vm612_vm0, %v1588_v22 }
 0x498   : > { %v1220_v25 = vpop.f32.mrb[16].mxu1 }
 0x499   : > { %v1221_v26 = vadd.f32 %v1220_v25, %v1117_v24  ;;  %v1222_v27 = vpop.f32.mrb[17].mxu1 }
 0x49a   : > { %v1223_v29 = vadd.f32 %v1222_v27, %v1117_v24  ;;  %v1224_v30 = vpop.f32.mrb[18].mxu1  ;;  %v1655_v27 = vmov 1966171168  }
 0x49b   : > { %v1225_v31 = vadd.f32 %v1224_v30, %v1122_v28  ;;  %v1226_v55 = vpop.f32.mrb[19].mxu1  ;;  %v1259_v23 = vmax.f32 %v1221_v26, 0.0  ;;  %v1275_v26 = vld [vmem:[%s2095_s5] sm:$0x1] }
 0x49c   : > { %v1227_v32 = vadd.f32 %v1226_v55, %v1122_v28  ;;  %v1260_v34 = vmax.f32 %v1223_v29, 0.0  ;;  %v1334_v28 = vunpack.c.l.s4 %v1655_v27  ;;  %v1285_v29 = vstv %s1284_s14 }
 0x49d   : > { %v1261_v33 = vmax.f32 %v1225_v31, 0.0 }
 0x49e   : > { %v1262_v5 = vmax.f32 %v1227_v32, 0.0  ;;  %v1335_v30 = vunpack.c.0.s8 %v1334_v28 }
 0x49f   : > { %v1276_v35 = vpack.c.bf16 %v1261_v33, %v1259_v23 }
 0x4a0   : > { %v1277_v37 = vpack.c.bf16 %v1262_v5, %v1260_v34  ;;  %v1230_v38 = vpop.f32.mrb[20].mxu1  ;;  %v1338_v33 = vsub.s32 %v1335_v30, %v1901_v53 }
 0x4a1   : > { %v1231_v39 = vadd.f32 %v1230_v38, %v1127_v36  ;;  %v1232_v40 = vpop.f32.mrb[21].mxu1 }
 0x4a2   : > { %v1233_v42 = vadd.f32 %v1232_v40, %v1127_v36  ;;  %v1234_v43 = vpop.f32.mrb[22].mxu1  ;;  %1289 = vmatprep.subr.bf16.mxu0 %v1277_v37 }
 0x4a3   : > { %v1235_v44 = vadd.f32 %v1234_v43, %v1132_v41  ;;  %v1236_v45 = vpop.f32.mrb[23].mxu1  ;;  %1290 = vmatpush1.bf16.msra.mxu0 %v1276_v35  ;;  %v1263_v58 = vmax.f32 %v1231_v39, 0.0 }
 0x4a4   : > { %v1237_v46 = vadd.f32 %v1236_v45, %v1132_v41  ;;  %v1264_v48 = vmax.f32 %v1233_v42, 0.0 }
 0x4a5   : > { %v1265_v47 = vmax.f32 %v1235_v44, 0.0 }
 0x4a6   : > { %v1266_v6 = vmax.f32 %v1237_v46, 0.0 }
 0x4a7   : > { %v1278_v7 = vpack.c.bf16 %v1265_v47, %v1263_v58 }
 0x4a8   : > { %v1279_v51 = vpack.c.bf16 %v1266_v6, %v1264_v48  ;;  %v1240_v54 = vpop.f32.mrb[24].mxu1 }
 0x4a9   : > { %v1241_v56 = vadd.f32 %v1240_v54, %v1137_v49  ;;  %v1242_v57 = vpop.f32.mrb[25].mxu1 }
 0x4aa   : > { %v1243_v8 = vadd.f32 %v1242_v57, %v1137_v49  ;;  %v1244_v9 = vpop.f32.mrb[26].mxu1  ;;  %1291 = vmatprep.subr.bf16.mxu0 %v1279_v51 }
 0x4ab   : > { %v1245_v52 = vadd.f32 %v1244_v9, %v1142_v59  ;;  %v1246_v60 = vpop.f32.mrb[27].mxu1  ;;  %1292 = vmatpush1.bf16.msra.mxu0 %v1278_v7  ;;  %v1267_v63 = vmax.f32 %v1241_v56, 0.0 }
 0x4ac   : > { %v1247_v61 = vadd.f32 %v1246_v60, %v1142_v59  ;;  %v1268_v0 = vmax.f32 %v1243_v8, 0.0 }
 0x4ad   : > { %v1269_v62 = vmax.f32 %v1245_v52, 0.0 }
 0x4ae   : > { %v1270_v1 = vmax.f32 %v1247_v61, 0.0 }
 0x4af   : > { %v1280_v2 = vpack.c.bf16 %v1269_v62, %v1267_v63 }
 0x4b0   : > { %v1281_v4 = vpack.c.bf16 %v1270_v1, %v1268_v0  ;;  %v1250_v10 = vpop.f32.mrb[28].mxu1 }
 0x4b1   : > { %v1251_v11 = vadd.f32 %v1250_v10, %v1147_v3  ;;  %v1252_v12 = vpop.f32.mrb[29].mxu1 }
 0x4b2   : > { %v1253_v14 = vadd.f32 %v1252_v12, %v1147_v3  ;;  %v1254_v15 = vpop.f32.mrb[30].mxu1  ;;  %1293 = vmatprep.subr.bf16.mxu0 %v1281_v4 }
 0x4b3   : > { %v1255_v16 = vadd.f32 %v1254_v15, %v1152_v13  ;;  %v1256_v17 = vpop.f32.mrb[31].mxu1  ;;  %1294 = vmatpush1.bf16.msra.mxu0 %v1280_v2  ;;  %v1271_v19 = vmax.f32 %v1251_v11, 0.0 }
 0x4b4   : > { %v1257_v18 = vadd.f32 %v1256_v17, %v1152_v13  ;;  %v1272_v21 = vmax.f32 %v1253_v14, 0.0 }
 0x4b5   : > { %v1273_v20 = vmax.f32 %v1255_v16, 0.0 }
 0x4b6   : > { %v1274_v22 = vmax.f32 %v1257_v18, 0.0 }
 0x4b7   : > { %v1282_v24 = vpack.c.bf16 %v1273_v20, %v1271_v19 }
 0x4b8   : > { %v1283_v25 = vpack.c.bf16 %v1274_v22, %v1272_v21 }
 0x4ba   : > { %1295 = vmatprep.subr.bf16.mxu0 %v1283_v25 }
 0x4bb   : > { %1296 = vmatpush1.bf16.msra.mxu0 %v1282_v24 }
 0x4be   : > { %1514 = vmatmul.mubr.msk.bf16.vlgmr.msra.gmra.mrb[32].mxu0 %vm612_vm0, %v1275_v26 }
 0x591   : > { %v1323_v31 = vpop.f32.mrb[32].mxu0 }
 0x592   : > { %v1324_v55 = vadd.f32 %v1323_v31, %v1285_v29  ;;  %v1325_v32 = vpop.f32.mrb[33].mxu0 }
 0x593   : > { %v1326_v23 = vadd.f32 %v1325_v32, %v1285_v29  ;;  %v1327_v34 = vpop.f32.mrb[34].mxu0 }
 0x594   : > { %v1328_v5 = vpop.f32.mrb[35].mxu0 }
 0x595   : > { %v1332_v35 = vcombine.low %v1324_v55, %v1326_v23 }
 0x597   : > { %v1339_v36 = vrot.slane %v1332_v35, %v1338_v33 }
 0x599   : > { %v1346_v37 = vrot.slane %v1339_v36, %v1338_v33 }
 0x59b   : > { %1352 = vst.msk [vmem:[%s273_s18] sm:$0x3] %vm1350_vm1, %v1346_v37 }
 0x59c   : > { %1602 = shalt.err (!%p1599_p3)
}
 0x59d   : > { %s1603_s9 = scalar_lea.hbm %s2048_s22, 32  ;;  %s1607_s15 = scalar_lea.hbm %s2097_s7, 64 }
 0x59e   : > { %p1604_p4 = scmp.ne.s32.totalorder %s2048_s22, %s1603_s9  ;;  %p1608_p9 = scmp.lt.u32.totalorder %s2048_s22, %s2097_s7 }
 0x59f   : > { %p1609_p10 = scmp.lt.u32.totalorder %s1607_s15, %s1603_s9  ;;  %p1611_p12 = scmp.lt.u32.totalorder %s1603_s9, %s2048_s22 }
 0x5a0   : > { %p1605_p7 = pnand %p1604_p4, %p1738_p5 }
 0x5a1   : > { %p1610_p11 = por %p1609_p10, %p1608_p9 }
 0x5a2   : > { %p1606_p8 = pneg %p1605_p7 }
 0x5a3   : > { %p1612_p13 = por %p1611_p12, %p1610_p11 }
 0x5a5   : > { %p1613_p0 = pnand %p1612_p13, %p1606_p8 }
 0x5a7   : > { %1616 = shalt.err (!%p1613_p0)
}
 0x5a8   : > { %1521 = dma.vmem_to_hbm [thread:$0]  (%p1738_p5), %s2050_s19, 32, %s2048_s22, %s1354_s23  }
 0x5a9 PF: > { %p1527_p1 = scmp.ge.s32.totalorder %s1651_s29, 2  ;;  %s1380_s18 = sand.u32 1, %s1639_s26  }
 0x5aa   : > { %s1381_s20 = scalar_lea.sflag [#allocation4], %s1380_s18 }
 0x5ab   : > { %p1524_p2 = pnand %p1527_p1, %p1742_p6 }
 0x5ad   : > { %1634 = dma.done.wait (!%p1524_p2), %s1381_s20, 32  }
 0x5ae   : > { %1636 = vsyncadd (!%p1524_p2), %s1381_s20, 4294967264  ;;  %p18_p3 = scmp.ge.s32.totalorder %s1725_s8, 4   ;;  %s2100_s26 = smov %s1643_s27 }
 0x5af   : > { %s2101_s27 = smov %s1647_s28  ;;  %s2102_s28 = smov %s1736_s11 }
 0x5b0   : > { %s2103_s29 = smov %s1725_s8  ;;  %20 = sbr.rel (!%p18_p3) target bundleno = 5 (0x5), region = 89 }
 0x5b7   :  { %1386 = vsyncpa [#allocation4], 1 }
 0x5b8   :  { %1388 = vsyncpa [#allocation4 + $0x1], 1 }

</bundles_post_ra>
